<compile_context>
chip_gen: v7x
topology: tpu7x:2x2x1
jax: 0.10.0
libtpu: 0.0.40
codegen_flags: <defaults>
</compile_context>

<pallas_src>
import functools

import jax
import jax.numpy as jnp
from jax import lax
from jax.experimental import pallas as pl
from jax.experimental.pallas import tpu as pltpu

_NEG_INF = -1e30  # finite "minus infinity" for masked (ragged) vocab columns


def _round_up(a, b):
    return (a + b - 1) // b * b


# --------------------------------------------------------------------------- #
# Pass 1: logits tile + online log-sum-exp over the vocab axis
# --------------------------------------------------------------------------- #
def _logits_stats_kernel(x_ref, w_ref, b_ref, logits_ref, logz_ref, m_sc, l_sc,
                         *, vocab, tn, mask_cols):
    j = pl.program_id(1)

    @pl.when(j == 0)
    def _():
        m_sc[...] = jnp.full_like(m_sc, -jnp.inf)
        l_sc[...] = jnp.zeros_like(l_sc)

    # x_ref: (tm, d_model); w_ref: (d_model, tn) -- weight pre-transposed once
    # at init so the MXU sees a plain A @ B (no per-step XLU transpose).
    logits = jnp.dot(x_ref[...], w_ref[...], preferred_element_type=jnp.float32)
    logits = logits + b_ref[...].astype(jnp.float32)

    if mask_cols:
        # Ragged last vocab tile handled in-kernel: no wrapper-side padding of
        # the weight / bias and no output slice afterwards.
        col = lax.broadcasted_iota(jnp.int32, logits.shape, 1) + j * tn
        logits = jnp.where(col < vocab, logits, _NEG_INF)

    # Intermediate logits stored in out_dtype (bf16 for bf16 models) to cut the
    # full-logits HBM round trip; LSE math stays in f32.
    logits_ref[...] = logits.astype(logits_ref.dtype)

    m_prev = m_sc[...]
    m_new = jnp.maximum(m_prev, jnp.max(logits, axis=-1, keepdims=True))
    l_sc[...] = l_sc[...] * jnp.exp(m_prev - m_new) + jnp.sum(
        jnp.exp(logits - m_new), axis=-1, keepdims=True
    )
    m_sc[...] = m_new

    @pl.when(j == pl.num_programs(1) - 1)
    def _():
        logz_ref[...] = m_sc[...] + jnp.log(l_sc[...])


# --------------------------------------------------------------------------- #
# Pass 2: out = logits - logZ  (pure streaming, memory-bound)
# --------------------------------------------------------------------------- #
def _normalize_kernel(logz_ref, logits_ref, o_ref):
    o_ref[...] = (logits_ref[...].astype(jnp.float32) - logz_ref[...]).astype(o_ref.dtype)


# --------------------------------------------------------------------------- #
# Generation-aware tuning helpers
# --------------------------------------------------------------------------- #
def _device_defaults():
    """(tm, tn, vmem_limit_bytes) per TPU generation."""
    kind = ""
    try:
        kind = jax.devices()[0].device_kind.lower()
    except Exception:  # pragma: no cover - defensive
        pass
    if "v5" in kind:   # 128 MiB VMEM but slower MXU: moderate row tile
        return 384, 512, 96 * 1024 * 1024
    if "v6" in kind:   # 128 MiB VMEM, 918 TF/s: large tm to beat weight-DMA roofline
        return 1024, 512, 100 * 1024 * 1024
    if "v7" in kind:   # 64 MiB VMEM per TensorCore
        return 512, 512, 56 * 1024 * 1024
    return 512, 512, 64 * 1024 * 1024


def _pass1_vmem_bytes(tm, tn, d_model, x_bytes, w_bytes, inter_bytes):
    """Rough double-buffered VMEM footprint of one pass-1 step."""
    return (2 * tm * d_model * x_bytes        # x block
            + 2 * d_model * tn * w_bytes      # weight block
            + 2 * tn * 4                      # bias block
            + 2 * tm * tn * inter_bytes       # logits block
            + 2 * tm * 4                      # logz block
            + 2 * tm * 4)                     # (m, l) scratch


# --------------------------------------------------------------------------- #
# Public API
# --------------------------------------------------------------------------- #
def prepare_generator_params(weight, bias):
    """One-time (init) conversion of nn.Linear params.

    weight: (vocab, d_model) PyTorch layout  ->  weight_t: (d_model, vocab)
    Done once at parameter setup so no per-call transpose/pad is needed.
    """
    return jnp.asarray(weight).T, jnp.asarray(bias)


@functools.partial(jax.jit, static_argnames=("tm", "tn", "tm2", "tn2"))
def generator_forward(x, weight_t, bias, *, tm=None, tn=None, tm2=None, tn2=None):
    """log_softmax(x @ weight_t + bias, axis=-1).

    x        : (..., d_model), any float dtype (bf16 recommended for big models)
    weight_t : (d_model, vocab)  -- see prepare_generator_params
    bias     : (vocab,)
    returns  : (..., vocab) in x.dtype
    """
    orig_shape = x.shape
    d_model = orig_shape[-1]
    vocab = weight_t.shape[1]
    out_dtype = x.dtype

    x2d = x.reshape(-1, d_model)
    M = x2d.shape[0]
    b2d = bias.reshape(1, vocab)

    # bf16 intermediate when the model runs sub-f32; keep f32 intermediates for
    # f32 outputs so accuracy is preserved.
    inter_dtype = jnp.float32 if out_dtype == jnp.float32 else out_dtype
    inter_bytes = jnp.dtype(inter_dtype).itemsize
    x_bytes = x2d.dtype.itemsize
    w_bytes = weight_t.dtype.itemsize

    tm_d, tn_d, vmem_limit = _device_defaults()
    if tm is None:
        tm = tm_d
    if tn is None:
        tn = tn_d
    tm = min(tm, _round_up(M, 8))
    tn = min(tn, _round_up(vocab, 128))

    # Clamp tiles so the double-buffered blocks fit the per-generation VMEM budget.
    budget = vmem_limit - 8 * 1024 * 1024
    while tm > 256 and _pass1_vmem_bytes(tm, tn, d_model, x_bytes, w_bytes, inter_bytes) > budget:
        tm = max(256, _round_up(tm // 2, 8))
    while tn > 256 and _pass1_vmem_bytes(tm, tn, d_model, x_bytes, w_bytes, inter_bytes) > budget:
        tn = max(256, _round_up(tn // 2, 128))
    # TODO(synk): add K (d_model) tiling (third 'arbitrary' grid axis + f32 VMEM
    # accumulator) for d_model large enough that even 256-sized blocks overflow VMEM.
    # TODO(synk): v7x small-M (decode) megacore split of the vocab axis with a
    # per-core (m, l) combine.

    num_m = pl.cdiv(M, tm)
    num_v = pl.cdiv(vocab, tn)
    mask_cols = (vocab % tn) != 0

    cost1 = pl.CostEstimate(
        flops=2 * M * d_model * vocab,
        transcendentals=M * vocab,
        bytes_accessed=(M * d_model * x_bytes
                        + num_m * vocab * d_model * w_bytes   # weight re-streamed per row tile
                        + M * vocab * inter_bytes
                        + M * 4),
    )

    kernel1 = functools.partial(_logits_stats_kernel,
                                vocab=vocab, tn=tn, mask_cols=mask_cols)

    # ---- Pass 1: logits + per-row logZ (online log-sum-exp over vocab) ----
    logits, logz = pl.pallas_call(
        kernel1,
        out_shape=(
            jax.ShapeDtypeStruct((M, vocab), inter_dtype),
            jax.ShapeDtypeStruct((M, 1), jnp.float32),
        ),
        grid_spec=pltpu.PrefetchScalarGridSpec(
            num_scalar_prefetch=0,
            grid=(num_m, num_v),
            in_specs=[
                pl.BlockSpec((tm, d_model), lambda i, j: (i, 0)),
                pl.BlockSpec((d_model, tn), lambda i, j: (0, j)),
                pl.BlockSpec((1, tn), lambda i, j: (0, j)),
            ],
            out_specs=(
                pl.BlockSpec((tm, tn), lambda i, j: (i, j)),
                pl.BlockSpec((tm, 1), lambda i, j: (i, 0)),
            ),
            scratch_shapes=[
                pltpu.VMEM((tm, 1), jnp.float32),   # running max
                pltpu.VMEM((tm, 1), jnp.float32),   # running sum-exp
            ],
        ),
        compiler_params=pltpu.CompilerParams(
            dimension_semantics=("parallel", "arbitrary"),
            vmem_limit_bytes=vmem_limit,
        ),
        cost_estimate=cost1,
    )(x2d, weight_t, b2d)

    # ---- Pass 2: normalize (logits - logZ) with its own large streaming blocks ----
    if tm2 is None:
        tm2 = min(512, _round_up(M, 8))
    if tn2 is None:
        tn2 = min(2048, _round_up(vocab, 128))

    out_bytes = jnp.dtype(out_dtype).itemsize
    cost2 = pl.CostEstimate(
        flops=M * vocab,
        transcendentals=0,
        bytes_accessed=M * vocab * (inter_bytes + out_bytes) + M * 4,
    )

    out = pl.pallas_call(
        _normalize_kernel,
        out_shape=jax.ShapeDtypeStruct((M, vocab), out_dtype),
        grid_spec=pltpu.PrefetchScalarGridSpec(
            num_scalar_prefetch=0,
            grid=(pl.cdiv(M, tm2), pl.cdiv(vocab, tn2)),
            in_specs=[
                pl.BlockSpec((tm2, 1), lambda i, j: (i, 0)),
                pl.BlockSpec((tm2, tn2), lambda i, j: (i, j)),
            ],
            out_specs=pl.BlockSpec((tm2, tn2), lambda i, j: (i, j)),
        ),
        compiler_params=pltpu.CompilerParams(
            dimension_semantics=("parallel", "parallel"),
            vmem_limit_bytes=vmem_limit,
        ),
        cost_estimate=cost2,
    )(logz, logits)

    return out.reshape(*orig_shape[:-1], vocab)


if __name__ == "__main__":
    # Small shapes consistent with the module: Generator(d_model, vocab).
    batch, seq, d_model, vocab = 2, 8, 32, 128

    key = jax.random.PRNGKey(0)
    kx, kw, kb = jax.random.split(key, 3)

    # nn.Linear parameter layout: weight (vocab, d_model), bias (vocab,).
    x = jax.random.normal(kx, (batch, seq, d_model), dtype=jnp.float32)
    weight = jax.random.normal(kw, (vocab, d_model), dtype=jnp.float32) * 0.05
    bias = jax.random.normal(kb, (vocab,), dtype=jnp.float32) * 0.01

    # One-time parameter prep (equivalent to module init), outside the hot path.
    weight_t, bias_p = prepare_generator_params(weight, bias)
    weight_t = jax.block_until_ready(weight_t)

    out = generator_forward(x, weight_t, bias_p)
    out = jax.block_until_ready(out)

    # Reference check against plain JAX (same semantics as the PyTorch module).
    ref = jax.nn.log_softmax(jnp.einsum("bsd,vd->bsv", x, weight) + bias, axis=-1)
    assert out.shape == (batch, seq, vocab)
    assert out.dtype == x.dtype
    assert jnp.allclose(out, ref, atol=1e-4, rtol=1e-4)

    print("KERNEL_OK")
</pallas_src>

<mosaic_0001>
module attributes {stable_mosaic.version = 11 : i64} {
  func.func @_logits_stats_kernel(%arg0: i32, %arg1: i32, %arg2: memref<16x32xf32, #tpu.memory_space<vmem>>, %arg3: memref<32x128xf32, #tpu.memory_space<vmem>>, %arg4: memref<1x128xf32, #tpu.memory_space<vmem>>, %arg5: memref<16x128xf32, #tpu.memory_space<vmem>>, %arg6: memref<16x1xf32, #tpu.memory_space<vmem>>, %arg7: memref<16x1xf32, #tpu.memory_space<vmem>>, %arg8: memref<16x1xf32, #tpu.memory_space<vmem>>) attributes {dimension_semantics = [#tpu.dimension_semantics<parallel>, #tpu.dimension_semantics<arbitrary>], iteration_bounds = array<i64: 1, 1>, scalar_prefetch = 0 : i64, scratch_operands = 2 : i64, tpu.core_type = #tpu.core_type<tc>, window_params = [{transform_indices = @transform_0, window_bounds = array<i64: 16, 32>}, {transform_indices = @transform_1, window_bounds = array<i64: 32, 128>}, {transform_indices = @transform_2, window_bounds = array<i64: 1, 128>}, {transform_indices = @transform_3, window_bounds = array<i64: 16, 128>}, {transform_indices = @transform_4, window_bounds = array<i64: 16, 1>}]} {
    %c0_i32 = arith.constant 0 : i32
    %0 = arith.cmpi eq, %arg1, %c0_i32 : i32
    %1 = arith.extui %0 : i1 to i32
    %c0_i32_0 = arith.constant 0 : i32
    %2 = arith.cmpi ne, %1, %c0_i32_0 : i32
    scf.if %2 {
      %cst_20 = arith.constant 0xFF800000 : f32
      %29 = vector.broadcast %cst_20 : f32 to vector<16x1xf32>
      %c0_21 = arith.constant 0 : index
      %c0_22 = arith.constant 0 : index
      %30 = vector.load %arg7[%c0_21, %c0_22] : memref<16x1xf32, #tpu.memory_space<vmem>>, vector<16x1xf32>
      tpu.vector_store %arg7[%c0_21, %c0_22], %29 {strides = array<i32>} : memref<16x1xf32, #tpu.memory_space<vmem>>, vector<16x1xf32>,
      %cst_23 = arith.constant 0.000000e+00 : f32
      %31 = vector.broadcast %cst_23 : f32 to vector<16x1xf32>
      %c0_24 = arith.constant 0 : index
      %c0_25 = arith.constant 0 : index
      %32 = vector.load %arg8[%c0_24, %c0_25] : memref<16x1xf32, #tpu.memory_space<vmem>>, vector<16x1xf32>
      tpu.vector_store %arg8[%c0_24, %c0_25], %31 {strides = array<i32>} : memref<16x1xf32, #tpu.memory_space<vmem>>, vector<16x1xf32>,
    } else {
    }
    %c0 = arith.constant 0 : index
    %c0_1 = arith.constant 0 : index
    %3 = vector.load %arg2[%c0, %c0_1] : memref<16x32xf32, #tpu.memory_space<vmem>>, vector<16x32xf32>
    %c0_2 = arith.constant 0 : index
    %c0_3 = arith.constant 0 : index
    %4 = vector.load %arg3[%c0_2, %c0_3] : memref<32x128xf32, #tpu.memory_space<vmem>>, vector<32x128xf32>
    %cst = arith.constant dense<0.000000e+00> : vector<16x128xf32>
    %5 = tpu.matmul %3, %4, %cst {dimension_numbers = #tpu.dot_dimension_numbers<[1], [0], [0], [1], [0, 0, 1, 1], [], []>} : vector<16x32xf32>, vector<32x128xf32>, vector<16x128xf32> -> vector<16x128xf32>
    %c0_4 = arith.constant 0 : index
    %c0_5 = arith.constant 0 : index
    %6 = vector.load %arg4[%c0_4, %c0_5] : memref<1x128xf32, #tpu.memory_space<vmem>>, vector<1x128xf32>
    %7 = vector.broadcast %6 : vector<1x128xf32> to vector<16x128xf32>
    %8 = arith.addf %5, %7 : vector<16x128xf32>
    %c0_6 = arith.constant 0 : index
    %c0_7 = arith.constant 0 : index
    %9 = vector.load %arg5[%c0_6, %c0_7] : memref<16x128xf32, #tpu.memory_space<vmem>>, vector<16x128xf32>
    tpu.vector_store %arg5[%c0_6, %c0_7], %8 {strides = array<i32>} : memref<16x128xf32, #tpu.memory_space<vmem>>, vector<16x128xf32>,
    %c0_8 = arith.constant 0 : index
    %c0_9 = arith.constant 0 : index
    %10 = vector.load %arg7[%c0_8, %c0_9] : memref<16x1xf32, #tpu.memory_space<vmem>>, vector<16x1xf32>
    %cst_10 = arith.constant dense<0xFF800000> : vector<16xf32>
    %11 = vector.multi_reduction <maximumf>, %8, %cst_10 [1] : vector<16x128xf32> to vector<16xf32>
    %12 = vector.shape_cast %11 : vector<16xf32> to vector<16x1xf32>
    %13 = arith.maximumf %10, %12 : vector<16x1xf32>
    %c0_11 = arith.constant 0 : index
    %c0_12 = arith.constant 0 : index
    %14 = vector.load %arg8[%c0_11, %c0_12] : memref<16x1xf32, #tpu.memory_space<vmem>>, vector<16x1xf32>
    %15 = arith.subf %10, %13 : vector<16x1xf32>
    %16 = math.exp %15 : vector<16x1xf32>
    %17 = arith.mulf %14, %16 : vector<16x1xf32>
    %18 = vector.broadcast %13 : vector<16x1xf32> to vector<16x128xf32>
    %19 = arith.subf %8, %18 : vector<16x128xf32>
    %20 = math.exp %19 : vector<16x128xf32>
    %cst_13 = arith.constant dense<0.000000e+00> : vector<16xf32>
    %21 = vector.multi_reduction <add>, %20, %cst_13 [1] : vector<16x128xf32> to vector<16xf32>
    %22 = vector.shape_cast %21 : vector<16xf32> to vector<16x1xf32>
    %23 = arith.addf %17, %22 : vector<16x1xf32>
    %c0_14 = arith.constant 0 : index
    %c0_15 = arith.constant 0 : index
    %24 = vector.load %arg8[%c0_14, %c0_15] : memref<16x1xf32, #tpu.memory_space<vmem>>, vector<16x1xf32>
    tpu.vector_store %arg8[%c0_14, %c0_15], %23 {strides = array<i32>} : memref<16x1xf32, #tpu.memory_space<vmem>>, vector<16x1xf32>,
    %c0_16 = arith.constant 0 : index
    %c0_17 = arith.constant 0 : index
    %25 = vector.load %arg7[%c0_16, %c0_17] : memref<16x1xf32, #tpu.memory_space<vmem>>, vector<16x1xf32>
    tpu.vector_store %arg7[%c0_16, %c0_17], %13 {strides = array<i32>} : memref<16x1xf32, #tpu.memory_space<vmem>>, vector<16x1xf32>,
    %c0_i32_18 = arith.constant 0 : i32
    %26 = arith.cmpi eq, %arg1, %c0_i32_18 : i32
    %27 = arith.extui %26 : i1 to i32
    %c0_i32_19 = arith.constant 0 : i32
    %28 = arith.cmpi ne, %27, %c0_i32_19 : i32
    scf.if %28 {
      %c0_20 = arith.constant 0 : index
      %c0_21 = arith.constant 0 : index
      %29 = vector.load %arg7[%c0_20, %c0_21] : memref<16x1xf32, #tpu.memory_space<vmem>>, vector<16x1xf32>
      %c0_22 = arith.constant 0 : index
      %c0_23 = arith.constant 0 : index
      %30 = vector.load %arg8[%c0_22, %c0_23] : memref<16x1xf32, #tpu.memory_space<vmem>>, vector<16x1xf32>
      %31 = math.log %30 : vector<16x1xf32>
      %32 = arith.addf %29, %31 : vector<16x1xf32>
      %c0_24 = arith.constant 0 : index
      %c0_25 = arith.constant 0 : index
      %33 = vector.load %arg6[%c0_24, %c0_25] : memref<16x1xf32, #tpu.memory_space<vmem>>, vector<16x1xf32>
      tpu.vector_store %arg6[%c0_24, %c0_25], %32 {strides = array<i32>} : memref<16x1xf32, #tpu.memory_space<vmem>>, vector<16x1xf32>,
    } else {
    }
    return
  }
  func.func @transform_0(%arg0: i32, %arg1: i32) -> (i32, i32) {
    %c0_i32 = arith.constant 0 : i32
    %c0_i32_0 = arith.constant 0 : i32
    return %arg0, %c0_i32 : i32, i32
  }
  func.func @transform_1(%arg0: i32, %arg1: i32) -> (i32, i32) {
    %c0_i32 = arith.constant 0 : i32
    %c0_i32_0 = arith.constant 0 : i32
    return %c0_i32, %arg1 : i32, i32
  }
  func.func @transform_2(%arg0: i32, %arg1: i32) -> (i32, i32) {
    %c0_i32 = arith.constant 0 : i32
    %c0_i32_0 = arith.constant 0 : i32
    return %c0_i32, %arg1 : i32, i32
  }
  func.func @transform_3(%arg0: i32, %arg1: i32) -> (i32, i32) {
    %c0_i32 = arith.constant 0 : i32
    return %arg0, %arg1 : i32, i32
  }
  func.func @transform_4(%arg0: i32, %arg1: i32) -> (i32, i32) {
    %c0_i32 = arith.constant 0 : i32
    %c0_i32_0 = arith.constant 0 : i32
    return %arg0, %c0_i32 : i32, i32
  }
}

module attributes {stable_mosaic.version = 11 : i64} {
  func.func @_normalize_kernel(%arg0: i32, %arg1: i32, %arg2: memref<16x1xf32, #tpu.memory_space<vmem>>, %arg3: memref<16x128xf32, #tpu.memory_space<vmem>>, %arg4: memref<16x128xf32, #tpu.memory_space<vmem>>) attributes {dimension_semantics = [#tpu.dimension_semantics<parallel>, #tpu.dimension_semantics<parallel>], iteration_bounds = array<i64: 1, 1>, scalar_prefetch = 0 : i64, scratch_operands = 0 : i64, tpu.core_type = #tpu.core_type<tc>, window_params = [{transform_indices = @transform_0, window_bounds = array<i64: 16, 1>}, {transform_indices = @transform_1, window_bounds = array<i64: 16, 128>}, {transform_indices = @transform_2, window_bounds = array<i64: 16, 128>}]} {
    %c0 = arith.constant 0 : index
    %c0_0 = arith.constant 0 : index
    %0 = vector.load %arg3[%c0, %c0_0] : memref<16x128xf32, #tpu.memory_space<vmem>>, vector<16x128xf32>
    %c0_1 = arith.constant 0 : index
    %c0_2 = arith.constant 0 : index
    %1 = vector.load %arg2[%c0_1, %c0_2] : memref<16x1xf32, #tpu.memory_space<vmem>>, vector<16x1xf32>
    %2 = vector.broadcast %1 : vector<16x1xf32> to vector<16x128xf32>
    %3 = arith.subf %0, %2 : vector<16x128xf32>
    %c0_3 = arith.constant 0 : index
    %c0_4 = arith.constant 0 : index
    %4 = vector.load %arg4[%c0_3, %c0_4] : memref<16x128xf32, #tpu.memory_space<vmem>>, vector<16x128xf32>
    tpu.vector_store %arg4[%c0_3, %c0_4], %3 {strides = array<i32>} : memref<16x128xf32, #tpu.memory_space<vmem>>, vector<16x128xf32>,
    return
  }
  func.func @transform_0(%arg0: i32, %arg1: i32) -> (i32, i32) {
    %c0_i32 = arith.constant 0 : i32
    %c0_i32_0 = arith.constant 0 : i32
    return %arg0, %c0_i32 : i32, i32
  }
  func.func @transform_1(%arg0: i32, %arg1: i32) -> (i32, i32) {
    %c0_i32 = arith.constant 0 : i32
    return %arg0, %arg1 : i32, i32
  }
  func.func @transform_2(%arg0: i32, %arg1: i32) -> (i32, i32) {
    %c0_i32 = arith.constant 0 : i32
    return %arg0, %arg1 : i32, i32
  }
}

</mosaic_0001>

<bundles_post_ra>
// kernel: generator_forward.3
= control target key start
LH: loop header
LB: loop body
LE: loop exit
PB: predicated region body
PF: predicated region fallthrough
CT: control target
= control target key end

     0   :  { %7 = vsyncpa [#allocation3], 0  ;;  %s221_s0 = inlined_call_operand.hbm [shape: f32[16,1], index: 0, kind: input, shape index: {}]   ;;  %s222_s1 = inlined_call_operand.hbm [shape: f32[16,128], index: 1, kind: input, shape index: {}]   ;;  %s223_s2 = inlined_call_operand.hbm [shape: f32[16,128], index: 2, kind: output, shape index: {}]  }
   0x1   :  { %8 = vsyncpa [#allocation6], 0 }
   0x2   :  { %9 = vsyncpa [#allocation4], 0  ;;  %s155_s9 = smov [#allocation2]   ;;  %s83_s13 = scalar_lea.hbm %s221_s0, 256 }
   0x3   :  { %s15_s10 = sshll.u32 %s155_s9, 4  ;;  %p84_p0 = scmp.ne.s32.totalorder %s221_s0, %s83_s13  ;;  %s16_s10 = int_to_ptr.vmem [resolvable:$true] %s15_s10 }
   0x4   :  { %p87_p1 = scmp.lt.u32.totalorder %s83_s13, %s221_s0 }
   0x6   :  { %p89_p2 = pnand %p87_p1, %p84_p0 }
   0x8   :  { %92 = shalt.err (!%p89_p2)
}
   0x9   :  { %s93_s18 = scalar_lea.vmem %s16_s10, 256  ;;  %p98_p4 = scmp.lt.s32.totalorder %s16_s10, %s16_s10 }
   0xa   :  { %p94_p3 = scmp.ne.s32.totalorder %s16_s10, %s93_s18  ;;  %p99_p5 = scmp.lt.s32.totalorder %s93_s18, %s93_s18 }
   0xc   :  { %p100_p6 = por %p99_p5, %p98_p4 }
   0xe   :  { %p101_p7 = pnand %p100_p6, %p94_p3 }
  0x10   :  { %104 = shalt.err (!%p101_p7)
}
  0x11   :  { %s156_s19 = smov 128   ;;  %s157_s20 = smov 8  }
  0x12   :  { %21 = dma.hbm_to_vmem [thread:$0]  %s221_s0, 256, %s16_s10, [#allocation3], %s156_s19, %s156_s19, %s157_s20  }
  0x13   :  { %s158_s23 = smov [#allocation5]   ;;  %s105_s27 = scalar_lea.hbm %s222_s1, 256 }
  0x14   :  { %s27_s24 = sshll.u32 %s158_s23, 4  ;;  %p106_p8 = scmp.ne.s32.totalorder %s222_s1, %s105_s27  ;;  %s28_s24 = int_to_ptr.vmem [resolvable:$true] %s27_s24 }
  0x15   :  { %p109_p9 = scmp.lt.u32.totalorder %s105_s27, %s222_s1 }
  0x17   :  { %p111_p10 = pnand %p109_p9, %p106_p8 }
  0x19   :  { %114 = shalt.err (!%p111_p10)
}
  0x1a   :  { %s115_s4 = scalar_lea.vmem %s28_s24, 256  ;;  %p120_p12 = scmp.lt.s32.totalorder %s28_s24, %s28_s24 }
  0x1b   :  { %p116_p11 = scmp.ne.s32.totalorder %s28_s24, %s115_s4  ;;  %p121_p13 = scmp.lt.s32.totalorder %s115_s4, %s115_s4 }
  0x1d   :  { %p122_p0 = por %p121_p13, %p120_p12 }
  0x1f   :  { %p123_p1 = pnand %p122_p0, %p116_p11 }
  0x21   :  { %126 = shalt.err (!%p123_p1)
}
  0x22   :  { %33 = dma.hbm_to_vmem [thread:$0]  %s222_s1, 256, %s28_s24, [#allocation6], %s156_s19, %s156_s19, %s157_s20  }
  0x23   :  { %149 = dma.done.wait [#allocation3], 256  }
  0x24   :  { %150 = vsyncadd [#allocation3], 4294967040 }
  0x25   :  { %151 = dma.done.wait [#allocation6], 256  }
  0x26   :  { %152 = vsyncadd [#allocation6], 4294967040  ;;  %v159_v0 = vmov 0   ;;  %v42_v1 = vld [vmem:[#allocation2] sm:$0xff]  ;;  %v43_v2 = vld [vmem:[#allocation2 + $0x8] sm:$0xff]  ;;  %s160_s6 = smov [#allocation7]  }
  0x27   :  { %82 = vset.pattern.permute.xlu0 %v159_v0  ;;  %v40_v3 = vld [vmem:[#allocation5] sm:$0xff]  ;;  %v41_v6 = vld [vmem:[#allocation5 + $0x8] sm:$0xff]  ;;  %s63_s7 = sshll.u32 %s160_s6, 4  ;;  %s64_s7 = int_to_ptr.vmem [resolvable:$true] %s63_s7 }
  0x28   :  { %46 = vperm.xlu0 %82, %v42_v1   ;;  %s127_s1 = scalar_lea.vmem %s64_s7, 256  ;;  %p132_p3 = scmp.lt.s32.totalorder %s64_s7, %s64_s7 }
  0x29   :  { %p128_p2 = scmp.ne.s32.totalorder %s64_s7, %s127_s1  ;;  %p133_p4 = scmp.lt.s32.totalorder %s127_s1, %s127_s1 }
  0x2b   :  { %p134_p5 = por %p133_p4, %p132_p3 }
  0x2c   :  { %51 = vperm.xlu0 %82, %v43_v2  }
  0x2d   :  { %p135_p6 = pnand %p134_p5, %p128_p2 }
  0xa7   :  { %v47_v4 = vpop.permute.xlu0 %46 }
  0xa8   :  { %v54_v5 = vsub.f32 %v40_v3, %v47_v4 }
  0xaa   :  { %56 = vst [vmem:[#allocation7] sm:$0xff] %v54_v5 }
  0xab   :  { %v52_v7 = vpop.permute.xlu0 %51 }
  0xac   :  { %v55_v8 = vsub.f32 %v41_v6, %v52_v7 }
  0xae   :  { %57 = vst [vmem:[#allocation7 + $0x8] sm:$0xff] %v55_v8 }
  0xaf   :  { %138 = shalt.err (!%p135_p6)
}
  0xb0   :  { %s139_s10 = scalar_lea.hbm %s223_s2, 256 }
  0xb1   :  { %p140_p7 = scmp.ne.s32.totalorder %s223_s2, %s139_s10  ;;  %p143_p8 = scmp.lt.u32.totalorder %s139_s10, %s223_s2 }
  0xb3   :  { %p145_p9 = pnand %p143_p8, %p140_p7 }
  0xb5   :  { %148 = shalt.err (!%p145_p9)
}
  0xb6   :  { %69 = dma.vmem_to_hbm [thread:$0]  %s64_s7, 256, %s223_s2, [#allocation4], %s156_s19, %s156_s19, %s157_s20  }
  0xb7   :  { %153 = dma.done.wait [#allocation4], 256  }
  0xb8   :  { %154 = vsyncadd [#allocation4], 4294967040 }
  0xb9   :  { %73 = vsyncpa [#allocation3], 1 }
  0xba   :  { %74 = vsyncpa [#allocation6], 1 }
  0xbb   :  { %75 = vsyncpa [#allocation4], 1 }

// kernel: generator_forward.2
= control target key start
LH: loop header
LB: loop body
LE: loop exit
PB: predicated region body
PF: predicated region fallthrough
CT: control target
= control target key end

     0   :  { %10 = vsyncpa [#allocation5], 0  ;;  %s551_s0 = inlined_call_operand.hbm [shape: f32[16,32], index: 0, kind: input, shape index: {}]   ;;  %s552_s1 = inlined_call_operand.hbm [shape: f32[32,128], index: 1, kind: input, shape index: {}]   ;;  %s553_s2 = inlined_call_operand.hbm [shape: f32[1,128], index: 2, kind: input, shape index: {}]   ;;  %s554_s3 = inlined_call_operand.hbm [shape: f32[16,128], index: 3, kind: output, shape index: {0}]   ;;  %s555_s4 = inlined_call_operand.hbm [shape: f32[16,1], index: 4, kind: output, shape index: {1}]  }
   0x1   :  { %11 = vsyncpa [#allocation8], 0 }
   0x2   :  { %12 = vsyncpa [#allocation6], 0 }
   0x3   :  { %13 = vsyncpa [#allocation12], 0  ;;  %s427_s15 = smov [#allocation7]   ;;  %s428_s17 = smov [#allocation4]  }
   0x4   :  { %s31_s16 = sshll.u32 %s427_s15, 4  ;;  %s19_s18 = sshll.u32 %s428_s17, 4  ;;  %s32_s16 = int_to_ptr.vmem [resolvable:$true] %s31_s16  ;;  %s462_s18 = int_to_ptr.vmem [resolvable:$true] %s19_s18 }
   0x5   :  { %s309_s21 = scalar_lea.hbm %s552_s1, 512 }
   0x6   :  { %p310_p0 = scmp.ne.s32.totalorder %s552_s1, %s309_s21  ;;  %p313_p1 = scmp.lt.u32.totalorder %s309_s21, %s552_s1 }
   0x8   :  { %p315_p2 = pnand %p313_p1, %p310_p0 }
   0xa   :  { %318 = shalt.err (!%p315_p2)
}
   0xb   :  { %s319_s26 = scalar_lea.vmem %s32_s16, 512  ;;  %p324_p4 = scmp.lt.s32.totalorder %s32_s16, %s32_s16 }
   0xc   :  { %p320_p3 = scmp.ne.s32.totalorder %s32_s16, %s319_s26  ;;  %p325_p5 = scmp.lt.s32.totalorder %s319_s26, %s319_s26 }
   0xe   :  { %p326_p6 = por %p325_p5, %p324_p4 }
  0x10   :  { %p327_p7 = pnand %p326_p6, %p320_p3 }
  0x12   :  { %330 = shalt.err (!%p327_p7)
}
  0x13   :  { %s429_s27 = smov 128   ;;  %s430_s28 = smov 8  }
  0x14   :  { %37 = dma.hbm_to_vmem [thread:$0]  %s552_s1, 512, %s32_s16, [#allocation8], %s429_s27, %s429_s27, %s430_s28  }
  0x15   :  { %s331_s7 = scalar_lea.hbm %s551_s0, 256 }
  0x16   :  { %p332_p8 = scmp.ne.s32.totalorder %s551_s0, %s331_s7  ;;  %p335_p9 = scmp.lt.u32.totalorder %s331_s7, %s551_s0 }
  0x18   :  { %p337_p10 = pnand %p335_p9, %p332_p8 }
  0x1a   :  { %340 = shalt.err (!%p337_p10)
}
  0x1b   :  { %s341_s12 = scalar_lea.vmem %s462_s18, 256  ;;  %p346_p12 = scmp.lt.s32.totalorder %s462_s18, %s462_s18 }
  0x1c   :  { %p342_p11 = scmp.ne.s32.totalorder %s462_s18, %s341_s12  ;;  %p347_p13 = scmp.lt.s32.totalorder %s341_s12, %s341_s12 }
  0x1e   :  { %p348_p0 = por %p347_p13, %p346_p12 }
  0x20   :  { %p349_p1 = pnand %p348_p0, %p342_p11 }
  0x22   :  { %352 = shalt.err (!%p349_p1)
}
  0x23   :  { %25 = dma.hbm_to_vmem [thread:$0]  %s551_s0, 256, %s462_s18, [#allocation5], %s429_s27, %s429_s27, %s430_s28  }
  0x24   :  { %s431_s14 = smov [#allocation9]   ;;  %s353_s19 = scalar_lea.hbm %s553_s2, 16 }
  0x25   :  { %s44_s15 = sshll.u32 %s431_s14, 4  ;;  %p354_p2 = scmp.ne.s32.totalorder %s553_s2, %s353_s19  ;;  %s45_s15 = int_to_ptr.vmem [resolvable:$true] %s44_s15 }
  0x26   :  { %p357_p3 = scmp.lt.u32.totalorder %s353_s19, %s553_s2 }
  0x28   :  { %p359_p4 = pnand %p357_p3, %p354_p2 }
  0x2a   :  { %362 = shalt.err (!%p359_p4)
}
  0x2b   :  { %s363_s24 = scalar_lea.vmem %s45_s15, 16  ;;  %s367_s0 = scalar_lea.vmem %s45_s15, 32 }
  0x2c   :  { %p364_p5 = scmp.ne.s32.totalorder %s45_s15, %s363_s24  ;;  %p368_p6 = scmp.lt.s32.totalorder %s45_s15, %s45_s15 }
  0x2d   :  { %p369_p7 = scmp.lt.s32.totalorder %s367_s0, %s363_s24 }
  0x2f   :  { %p370_p8 = por %p369_p7, %p368_p6 }
  0x31   :  { %p371_p9 = pnand %p370_p8, %p364_p5 }
  0x33   :  { %374 = shalt.err (!%p371_p9)
}
  0x34   :  { %47 = dma.hbm_to_vmem [thread:$0]  %s553_s2, 16, %s45_s15, [#allocation8]  }
  0x35   :  { %419 = dma.done.wait [#allocation5], 256  }
  0x36   :  { %420 = vsyncadd [#allocation5], 4294967040 }
  0x37   :  { %421 = dma.done.wait [#allocation8], 528  }
  0x38   :  { %422 = vsyncadd [#allocation8], 4294966768  ;;  %vm79_vm0 = vcmask 261120   ;;  %v68_v0 = vld [vmem:[#allocation7] sm:$0xff]  ;;  %v69_v1 = vld [vmem:[#allocation7 + $0x8] sm:$0xff]  ;;  %vm61_vm1 = vcmask 7168  }
  0x39   :  { %v70_v2 = vld [vmem:[#allocation7 + $0x10] sm:$0xff]  ;;  %v277_v3 = vpack.c.bf16 %v69_v1, %v68_v0  ;;  %v71_v4 = vld [vmem:[#allocation7 + $0x18] sm:$0xff]  ;;  %v432_v8 = vmov -inf   ;;  %v257_v9 = vld [vmem:[#allocation9] ss:$0 sm:$0xff]  ;;  %v433_v14 = vmov 0  }
  0x3a   :  { %v66_v5 = vld [vmem:[#allocation4] sm:$0xff]  ;;  %v281_v6 = vpack.c.bf16 %v71_v4, %v70_v2  ;;  %v67_v7 = vld [vmem:[#allocation4 + $0x8] sm:$0xff]  ;;  %62 = vst.msk [vmem:[#allocation2] sm:$0xff] %vm61_vm1, %v432_v8  ;;  %63 = vst.msk [vmem:[#allocation2 + $0x8] sm:$0xff] %vm61_vm1, %v432_v8  ;;  %295 = vset.pattern.permute.xlu1 %v433_v14  ;;  %296 = vset.pattern.permute.xlu0 %v433_v14  ;;  %v434_v15 = vmov 0.0   ;;  %s435_s2 = smov [#allocation10]  }
  0x3b   :  { %274 = vmatprep.mubr.msk.f32.mxu0 %vm79_vm0, %v66_v5  ;;  %278 = vmatprep.subr.bf16.mxu0 %v277_v3  ;;  %64 = vst.msk [vmem:[#allocation3] sm:$0xff] %vm61_vm1, %v434_v15  ;;  %65 = vst.msk [vmem:[#allocation3 + $0x8] sm:$0xff] %vm61_vm1, %v434_v15  ;;  %s228_s26 = sshll.u32 %s435_s2, 4  ;;  %s229_s26 = int_to_ptr.vmem [resolvable:$true] %s228_s26 }
  0x3c   :  { %280 = vmatpush3.bf16.msra.mxu0 %v277_v3  ;;  %s375_s29 = scalar_lea.vmem %s229_s26, 256  ;;  %p380_p11 = scmp.lt.s32.totalorder %s229_s26, %s229_s26 }
  0x3d   :  { %282 = vmatprep.subr.bf16.mxu0 %v281_v6  ;;  %p376_p10 = scmp.ne.s32.totalorder %s229_s26, %s375_s29  ;;  %p381_p12 = scmp.lt.s32.totalorder %s375_s29, %s375_s29 }
  0x3f   :  { %p382_p13 = por %p381_p12, %p380_p11 }
  0x40   :  { %284 = vmatpush3.bf16.msra.mxu0 %v281_v6 }
  0x41   :  { %v163_v16 = vld [vmem:[#allocation2] sm:$0xff]  ;;  %v164_v19 = vld [vmem:[#allocation2 + $0x8] sm:$0xff]  ;;  %p383_p0 = pnand %p382_p13, %p376_p10 }
  0x43   :  { %275 = vmatmul.mubr.msk.f32.vlgmr.msra.gmra.mrb[0].mxu0 %vm79_vm0, %v67_v7 }
 0x116   :  { %v276_v10 = vpop.f32.mrb[0].mxu0 }
 0x117   :  { %v158_v11 = vadd.f32 %v276_v10, %v257_v9  ;;  %v152_v12 = vpop.f32.mrb[1].mxu0 }
 0x118   :  { %v153_v13 = vadd.f32 %v257_v9, %v152_v12 }
 0x119   :  { %162 = vst [vmem:[#allocation10 + $0x8] sm:$0xff] %v158_v11 }
 0x11a   :  { %161 = vst [vmem:[#allocation10] sm:$0xff] %v153_v13  ;;  %165 = vmax.xlane.f32.xlu0 %v153_v13 }
 0x11e   :  { %167 = vmax.xlane.f32.xlu0 %v158_v11 }
 0x1a7   :  { %v166_v17 = vpop.xlane.xlu0 %165 }
 0x1a8   :  { %v169_v18 = vmax.f32 %v163_v16, %v166_v17 }
 0x1aa   :  { %v173_v20 = vsub.f32 %v163_v16, %v169_v18  ;;  %206 = vst.msk [vmem:[#allocation2] sm:$0xff] %vm61_vm1, %v169_v18  ;;  %183 = vperm.xlu1 %295, %v169_v18  }
 0x1ab   :  { %v168_v21 = vpop.xlane.xlu0 %167 }
 0x1ac   :  { %v170_v22 = vmax.f32 %v164_v19, %v168_v21 }
 0x1ae   :  { %v174_v23 = vsub.f32 %v164_v19, %v170_v22  ;;  %207 = vst.msk [vmem:[#allocation2 + $0x8] sm:$0xff] %vm61_vm1, %v170_v22  ;;  %188 = vperm.xlu1 %295, %v170_v22  }
 0x229   :  { %v184_v24 = vpop.permute.xlu1 %183 }
 0x22a   :  { %v191_v25 = vsub.f32 %v153_v13, %v184_v24 }
 0x22c   :  { %v193_v26 = vmul.f32 1.442695, %v191_v25 }
 0x22d   :  { %v189_v27 = vpop.permute.xlu1 %188 }
 0x22e   :  { %297 = vpow2.f32 %v193_v26  ;;  %v192_v28 = vsub.f32 %v158_v11, %v189_v27 }
 0x230   :  { %v195_v29 = vmul.f32 1.442695, %v192_v28 }
 0x232   :  { %299 = vpow2.f32 %v195_v29 }
 0x238   :  { %v298_v30 = vpop.eup %297 }
 0x239   :  { %197 = vadd.xlane.f32.xlu0 %v298_v30 }
 0x23c   :  { %v300_v31 = vpop.eup %299 }
 0x23d   :  { %199 = vadd.xlane.f32.xlu1 %v300_v31 }
 0x23e   :  { %386 = shalt.err (!%p383_p0)
}
 0x23f   :  { %s387_s6 = scalar_lea.hbm %s554_s3, 256 }
 0x240   :  { %p388_p1 = scmp.ne.s32.totalorder %s554_s3, %s387_s6  ;;  %p391_p2 = scmp.lt.u32.totalorder %s387_s6, %s554_s3 }
 0x242   :  { %p393_p3 = pnand %p391_p2, %p388_p1 }
 0x244   :  { %396 = shalt.err (!%p393_p3)
}
 0x245   :  { %234 = dma.vmem_to_hbm [thread:$0]  %s229_s26, 256, %s554_s3, [#allocation6], %s429_s27, %s429_s27, %s430_s28   ;;  %v175_v32 = vmul.f32 1.442695, %v173_v20  ;;  %v177_v33 = vmul.f32 1.442695, %v174_v23 }
 0x246   :  { %v171_v35 = vld [vmem:[#allocation3] sm:$0xff]  ;;  %v172_v39 = vld [vmem:[#allocation3 + $0x8] sm:$0xff]  ;;  %v211_v48 = vld [vmem:[#allocation2] sm:$0xff]  ;;  %s436_s3 = smov [#allocation11]  }
 0x247   :  { %301 = vpow2.f32 %v175_v32  ;;  %s240_s1 = sshll.u32 %s436_s3, 4  ;;  %v212_v52 = vld [vmem:[#allocation2 + $0x8] sm:$0xff]  ;;  %s241_s1 = int_to_ptr.vmem [resolvable:$true] %s240_s1 }
 0x248   :  { %303 = vpow2.f32 %v177_v33  ;;  %s397_s13 = scalar_lea.vmem %s241_s1, 256  ;;  %p402_p5 = scmp.lt.s32.totalorder %s241_s1, %s241_s1 }
 0x249   :  { %p398_p4 = scmp.ne.s32.totalorder %s241_s1, %s397_s13  ;;  %p403_p6 = scmp.lt.s32.totalorder %s397_s13, %s397_s13 }
 0x24b   :  { %p404_p7 = por %p403_p6, %p402_p5 }
 0x24d   :  { %p405_p8 = pnand %p404_p7, %p398_p4 }
 0x251   :  { %v302_v34 = vpop.eup %301 }
 0x252   :  { %v179_v36 = vmul.f32 %v302_v34, %v171_v35  ;;  %v304_v37 = vpop.eup %303 }
 0x253   :  { %v180_v41 = vmul.f32 %v304_v37, %v172_v39 }
 0x2c6   :  { %v198_v38 = vpop.xlane.xlu0 %197 }
 0x2c7   :  { %v201_v40 = vadd.f32 %v198_v38, %v179_v36 }
 0x2c9   :  { %204 = vst.msk [vmem:[#allocation3] sm:$0xff] %vm61_vm1, %v201_v40 }
 0x2ca   :  { %v200_v42 = vpop.xlane.xlu1 %199 }
 0x2cb   :  { %v202_v43 = vadd.f32 %v200_v42, %v180_v41 }
 0x2cd   :  { %205 = vst.msk [vmem:[#allocation3 + $0x8] sm:$0xff] %vm61_vm1, %v202_v43 }
 0x2d0   :  { %v213_v44 = vld [vmem:[#allocation3] sm:$0xff] }
 0x2d1   :  { %305 = vlog2.f32 %v213_v44 }
 0x2d4   :  { %v214_v45 = vld [vmem:[#allocation3 + $0x8] sm:$0xff] }
 0x2d5   :  { %307 = vlog2.f32 %v214_v45 }
 0x2db   :  { %v306_v46 = vpop.eup %305 }
 0x2dc   :  { %v216_v47 = vmul.f32 0.6931472, %v306_v46 }
 0x2de   :  { %v219_v49 = vadd.f32 %v216_v47, %v211_v48 }
 0x2df   :  { %v308_v50 = vpop.eup %307 }
 0x2e0   :  { %v218_v51 = vmul.f32 0.6931472, %v308_v50  ;;  %221 = vst.msk [vmem:[#allocation11] sm:$0xff] %vm61_vm1, %v219_v49 }
 0x2e2   :  { %v220_v53 = vadd.f32 %v218_v51, %v212_v52 }
 0x2e4   :  { %222 = vst.msk [vmem:[#allocation11 + $0x8] sm:$0xff] %vm61_vm1, %v220_v53 }
 0x2e5   :  { %408 = shalt.err (!%p405_p8)
}
 0x2e6   :  { %s409_s16 = scalar_lea.hbm %s555_s4, 256 }
 0x2e7   :  { %p410_p9 = scmp.ne.s32.totalorder %s555_s4, %s409_s16  ;;  %p413_p10 = scmp.lt.u32.totalorder %s409_s16, %s555_s4 }
 0x2e9   :  { %p415_p11 = pnand %p413_p10, %p410_p9 }
 0x2eb   :  { %418 = shalt.err (!%p415_p11)
}
 0x2ec   :  { %246 = dma.vmem_to_hbm [thread:$0]  %s241_s1, 256, %s555_s4, [#allocation12], %s429_s27, %s429_s27, %s430_s28  }
 0x2ed   :  { %423 = dma.done.wait [#allocation6], 256  }
 0x2ee   :  { %424 = vsyncadd [#allocation6], 4294967040 }
 0x2ef   :  { %425 = dma.done.wait [#allocation12], 256  }
 0x2f0   :  { %426 = vsyncadd [#allocation12], 4294967040 }
 0x2f1   :  { %253 = vsyncpa [#allocation5], 1 }
 0x2f2   :  { %254 = vsyncpa [#allocation8], 1 }
 0x2f3   :  { %255 = vsyncpa [#allocation6], 1 }
 0x2f4   :  { %256 = vsyncpa [#allocation12], 1 }

</bundles_post_ra>
